<compile_context>
chip_gen: v6e
topology: v6e:2x2x1
jax: 0.10.0
libtpu: 0.0.40
codegen_flags: <defaults>
</compile_context>

<pallas_src>
import functools

import jax
import jax.numpy as jnp
from jax import lax
from jax.experimental import pallas as pl
from jax.experimental.pallas import tpu as pltpu

LN_EPS = 1e-5


# ----------------------------- Pallas kernel -------------------------------

def _patch_merging_kernel(x_ref, w_ref, b_ref, o_ref, *, eps, inv_k):
    # x_ref: (K, tile_m) f32  -- merged channels on sublanes, tokens on lanes
    # w_ref: (N, K)      bf16 -- reduction weight with LN gamma folded in
    # b_ref: (N, 1)      f32  -- LN beta folded through the reduction weight
    # o_ref: (N, tile_m) f32  -- lane-dense output (tokens on lanes)
    x = x_ref[...]
    mean = jnp.sum(x, axis=0, keepdims=True) * inv_k            # (1, tile_m)
    xc = x - mean
    var = jnp.sum(xc * xc, axis=0, keepdims=True) * inv_k       # biased var (nn.LayerNorm)
    xhat = xc * lax.rsqrt(var + eps)                            # f32 VPU/EUP epilogue
    acc = jnp.dot(w_ref[...], xhat.astype(jnp.bfloat16),
                  preferred_element_type=jnp.float32)           # bf16 MXU, f32 accumulate
    o_ref[...] = acc + b_ref[...]


# ------------------------------- forward -----------------------------------

def patch_merging_forward(params, x, *, eps=LN_EPS, max_tile_m=2048):
    """PatchMerging forward.  x: (B, C, H, W) NCHW -> (B, out_dim, H//2, W//2)."""
    B, C, H, W = x.shape
    Ho, Wo = H // 2, W // 2
    K = 4 * C
    N = params["reduction_w"].shape[0]
    M = B * Ho * Wo

    # -- 2x2 strided patch gather + concat (layout plumbing, plain JAX) --
    # TODO(synk): the strided gather / NCHW<->NHWC permutes are pure layout
    # plumbing left to XLA; only the LN+GEMM core is compute and lives in Pallas.
    xh = jnp.transpose(x, (0, 2, 3, 1))                         # NHWC
    x0 = xh[:, 0::2, 0::2, :]
    x1 = xh[:, 1::2, 0::2, :]
    x2 = xh[:, 0::2, 1::2, :]
    x3 = xh[:, 1::2, 1::2, :]
    xcat = jnp.concatenate([x0, x1, x2, x3], axis=-1)           # (B, Ho, Wo, 4C)
    xkm = xcat.reshape(M, K).T.astype(jnp.float32)              # (K, M) lane-dense slab

    # -- fold LayerNorm affine (gamma, beta) into the reduction GEMM --
    gamma = params["ln_gamma"].astype(jnp.float32)
    beta = params["ln_beta"].astype(jnp.float32)
    w = params["reduction_w"].astype(jnp.float32)               # (N, K), PyTorch layout
    w_fold = (w * gamma[None, :]).astype(jnp.bfloat16)          # (N, K) bf16 MXU operand
    b_fold = (w @ beta).reshape(N, 1)                           # (N, 1) f32 bias

    # -- lane-aligned tiling over tokens (single big tile unless M is huge) --
    Mp = ((M + 127) // 128) * 128
    if Mp <= max_tile_m:
        tile_m = Mp
    else:
        tile_m = max_tile_m
        Mp = ((M + tile_m - 1) // tile_m) * tile_m
    if Mp != M:
        xkm = jnp.pad(xkm, ((0, 0), (0, Mp - M)))

    y_t = pl.pallas_call(
        functools.partial(_patch_merging_kernel, eps=eps, inv_k=1.0 / K),
        out_shape=jax.ShapeDtypeStruct((N, Mp), jnp.float32),
        grid=(Mp // tile_m,),
        in_specs=[
            pl.BlockSpec((K, tile_m), lambda i: (0, i)),
            pl.BlockSpec((N, K), lambda i: (0, 0)),
            pl.BlockSpec((N, 1), lambda i: (0, 0)),
        ],
        out_specs=pl.BlockSpec((N, tile_m), lambda i: (0, i)),
        compiler_params=pltpu.CompilerParams(
            dimension_semantics=("parallel",)),                 # M-tiles split across TCs (v7x)
    )(xkm, w_fold, b_fold)

    y = y_t[:, :M].reshape(N, B, Ho, Wo)                        # (out_dim, B, Ho, Wo)
    return jnp.transpose(y, (1, 0, 2, 3))                       # NCHW, like the reference


# --------------------------- pure-JAX reference ----------------------------

def patch_merging_ref(params, x, eps=LN_EPS):
    B, C, H, W = x.shape
    xh = jnp.transpose(x, (0, 2, 3, 1))
    x0 = xh[:, 0::2, 0::2, :]
    x1 = xh[:, 1::2, 0::2, :]
    x2 = xh[:, 0::2, 1::2, :]
    x3 = xh[:, 1::2, 1::2, :]
    xc = jnp.concatenate([x0, x1, x2, x3], axis=-1).reshape(B, -1, 4 * C)
    mu = jnp.mean(xc, axis=-1, keepdims=True)
    var = jnp.mean((xc - mu) ** 2, axis=-1, keepdims=True)
    xn = (xc - mu) / jnp.sqrt(var + eps) * params["ln_gamma"] + params["ln_beta"]
    y = xn @ params["reduction_w"].T                            # Linear, bias=False
    y = y.reshape(B, H // 2, W // 2, -1)
    return jnp.transpose(y, (0, 3, 1, 2))


# ------------------------------ parameters ---------------------------------

def init_params(key, dim, out_dim):
    k1, k2, k3 = jax.random.split(key, 3)
    return dict(
        ln_gamma=1.0 + 0.1 * jax.random.normal(k1, (4 * dim,), jnp.float32),
        ln_beta=0.05 * jax.random.normal(k2, (4 * dim,), jnp.float32),
        reduction_w=0.2 * jax.random.normal(k3, (out_dim, 4 * dim), jnp.float32),
    )


if __name__ == "__main__":
    dim, out_dim = 4, 8                 # PatchMerging(dim=4, out_dim=8)
    B, H, W = 2, 16, 16

    key = jax.random.PRNGKey(0)
    kp, kx = jax.random.split(key)
    params = init_params(kp, dim, out_dim)
    x = jax.random.normal(kx, (B, dim, H, W), jnp.float32)

    fwd = jax.jit(patch_merging_forward)
    y = jax.block_until_ready(fwd(params, x))
    assert y.shape == (B, out_dim, H // 2, W // 2), y.shape

    y_ref = patch_merging_ref(params, x)
    err = float(jnp.max(jnp.abs(y - y_ref)))
    assert err < 1e-1, f"max abs err vs reference: {err}"       # bf16 MXU tolerance
    print("KERNEL_OK")
</pallas_src>

<mosaic_0001>
module attributes {stable_mosaic.version = 11 : i64} {
  func.func @_patch_merging_kernel(%arg0: i32, %arg1: memref<16x128xf32, #tpu.memory_space<vmem>>, %arg2: memref<8x16xbf16, #tpu.memory_space<vmem>>, %arg3: memref<8x1xf32, #tpu.memory_space<vmem>>, %arg4: memref<8x128xf32, #tpu.memory_space<vmem>>) attributes {dimension_semantics = [#tpu.dimension_semantics<parallel>], iteration_bounds = array<i64: 1>, scalar_prefetch = 0 : i64, scratch_operands = 0 : i64, tpu.core_type = #tpu.core_type<tc>, window_params = [{transform_indices = @transform_0, window_bounds = array<i64: 16, 128>}, {pipeline_mode = #tpu.pipeline_mode<synchronous>, transform_indices = @transform_1, window_bounds = array<i64: 8, 16>}, {pipeline_mode = #tpu.pipeline_mode<synchronous>, transform_indices = @transform_2, window_bounds = array<i64: 8, 1>}, {transform_indices = @transform_3, window_bounds = array<i64: 8, 128>}]} {
    %c0 = arith.constant 0 : index
    %c0_0 = arith.constant 0 : index
    %0 = vector.load %arg1[%c0, %c0_0] : memref<16x128xf32, #tpu.memory_space<vmem>>, vector<16x128xf32>
    %cst = arith.constant dense<0.000000e+00> : vector<128xf32>
    %1 = vector.multi_reduction <add>, %0, %cst [0] : vector<16x128xf32> to vector<128xf32>
    %2 = vector.shape_cast %1 : vector<128xf32> to vector<1x128xf32>
    %cst_1 = arith.constant 6.250000e-02 : f32
    %3 = vector.broadcast %cst_1 : f32 to vector<1x128xf32>
    %4 = arith.mulf %2, %3 : vector<1x128xf32>
    %5 = vector.broadcast %4 : vector<1x128xf32> to vector<16x128xf32>
    %6 = arith.subf %0, %5 : vector<16x128xf32>
    %7 = arith.mulf %6, %6 : vector<16x128xf32>
    %cst_2 = arith.constant dense<0.000000e+00> : vector<128xf32>
    %8 = vector.multi_reduction <add>, %7, %cst_2 [0] : vector<16x128xf32> to vector<128xf32>
    %9 = vector.shape_cast %8 : vector<128xf32> to vector<1x128xf32>
    %cst_3 = arith.constant 6.250000e-02 : f32
    %10 = vector.broadcast %cst_3 : f32 to vector<1x128xf32>
    %11 = arith.mulf %9, %10 : vector<1x128xf32>
    %cst_4 = arith.constant 9.99999974E-6 : f32
    %12 = vector.broadcast %cst_4 : f32 to vector<1x128xf32>
    %13 = arith.addf %11, %12 : vector<1x128xf32>
    %14 = math.rsqrt %13 : vector<1x128xf32>
    %15 = vector.broadcast %14 : vector<1x128xf32> to vector<16x128xf32>
    %16 = arith.mulf %6, %15 : vector<16x128xf32>
    %c0_5 = arith.constant 0 : index
    %c0_6 = arith.constant 0 : index
    %17 = vector.load %arg2[%c0_5, %c0_6] : memref<8x16xbf16, #tpu.memory_space<vmem>>, vector<8x16xbf16>
    %18 = arith.truncf %16 : vector<16x128xf32> to vector<16x128xbf16>
    %cst_7 = arith.constant dense<0.000000e+00> : vector<8x128xf32>
    %19 = tpu.matmul %17, %18, %cst_7 {dimension_numbers = #tpu.dot_dimension_numbers<[1], [0], [0], [1], [0, 0, 1, 1], [], []>} : vector<8x16xbf16>, vector<16x128xbf16>, vector<8x128xf32> -> vector<8x128xf32>
    %c0_8 = arith.constant 0 : index
    %c0_9 = arith.constant 0 : index
    %20 = vector.load %arg3[%c0_8, %c0_9] : memref<8x1xf32, #tpu.memory_space<vmem>>, vector<8x1xf32>
    %21 = vector.broadcast %20 : vector<8x1xf32> to vector<8x128xf32>
    %22 = arith.addf %19, %21 : vector<8x128xf32>
    %c0_10 = arith.constant 0 : index
    %c0_11 = arith.constant 0 : index
    %23 = vector.load %arg4[%c0_10, %c0_11] : memref<8x128xf32, #tpu.memory_space<vmem>>, vector<8x128xf32>
    tpu.vector_store %arg4[%c0_10, %c0_11], %22 {strides = array<i32>} : memref<8x128xf32, #tpu.memory_space<vmem>>, vector<8x128xf32>,
    return
  }
  func.func @transform_0(%arg0: i32) -> (i32, i32) {
    %c0_i32 = arith.constant 0 : i32
    %c0_i32_0 = arith.constant 0 : i32
    return %c0_i32, %arg0 : i32, i32
  }
  func.func @transform_1(%arg0: i32) -> (i32, i32) {
    %c0_i32 = arith.constant 0 : i32
    %c0_i32_0 = arith.constant 0 : i32
    %c0_i32_1 = arith.constant 0 : i32
    return %c0_i32, %c0_i32_0 : i32, i32
  }
  func.func @transform_2(%arg0: i32) -> (i32, i32) {
    %c0_i32 = arith.constant 0 : i32
    %c0_i32_0 = arith.constant 0 : i32
    %c0_i32_1 = arith.constant 0 : i32
    return %c0_i32, %c0_i32_0 : i32, i32
  }
  func.func @transform_3(%arg0: i32) -> (i32, i32) {
    %c0_i32 = arith.constant 0 : i32
    %c0_i32_0 = arith.constant 0 : i32
    return %c0_i32, %arg0 : i32, i32
  }
}

</mosaic_0001>

<bundles_post_ra>
// kernel: patch_merging_forward.1
= control target key start
LH: loop header
LB: loop body
LE: loop exit
PB: predicated region body
PF: predicated region fallthrough
CT: control target
= control target key end

     0   :  { %v113_v0 = vmov 0.0   ;;  %vm114_vm0 = vmmov 0   ;;  %v115_v4 = vmov 0   ;;  %vm49_vm1 = vcmask 130048   ;;  %s151_s0 = inlined_call_operand.vmem [shape: f32[16,128], index: 0, kind: input, shape index: {}]   ;;  %s152_s2 = inlined_call_operand.vmem [shape: f32[8,1], index: 2, kind: input, shape index: {}]   ;;  %s153_s1 = inlined_call_operand.vmem [shape: bf16[8,16], index: 1, kind: input, shape index: {}]   ;;  %s154_s3 = inlined_call_operand.vmem [shape: f32[8,128], index: 3, kind: output, shape index: {}]  }
   0x1   :  { %101 = vmatprep.subr.bf16.mxu0 %v113_v0  ;;  %v15_v1 = vld [vmem:[%s151_s0] sm:$0xff]  ;;  %v16_v2 = vld [vmem:[%s151_s0 + $0x8] sm:$0xff]  ;;  %103 = vmatprep.mubr.msk.bf16.mxu0 %vm114_vm0, %v113_v0 }
   0x2   :  { %v17_v3 = vadd.f32 %v16_v2, %v15_v1  ;;  %110 = vset.pattern.permute.xlu0 %v115_v4  ;;  %v43_v5 = vld [vmem:[%s152_s2] sm:$0xff] }
   0x3   :  { %46 = vperm.xlu0 %110, %v43_v5   ;;  %v41_v30 = vld [vmem:[%s153_s1] sm:$0xf] }
   0x4   :  { %v18_v6 = vrot.slane %v17_v3, 4 }
   0x6   :  { %v19_v7 = vadd.f32 %v18_v6, %v17_v3 }
   0x8   :  { %v20_v8 = vrot.slane %v19_v7, 2 }
   0xa   :  { %v21_v9 = vadd.f32 %v20_v8, %v19_v7 }
   0xc   :  { %v22_v10 = vrot.slane %v21_v9, 1 }
   0xe   :  { %v23_v11 = vadd.f32 %v22_v10, %v21_v9 }
  0x10   :  { %v24_v12 = vmul.f32 0.0625, %v23_v11 }
  0x12   :  { %v25_v13 = vsub.f32 %v15_v1, %v24_v12  ;;  %v26_v14 = vsub.f32 %v16_v2, %v24_v12 }
  0x14   :  { %v27_v15 = vmul.f32 %v25_v13, %v25_v13  ;;  %v28_v16 = vmul.f32 %v26_v14, %v26_v14 }
  0x16   :  { %v29_v17 = vadd.f32 %v28_v16, %v27_v15 }
  0x18   :  { %v30_v18 = vrot.slane %v29_v17, 4 }
  0x1a   :  { %v31_v19 = vadd.f32 %v30_v18, %v29_v17 }
  0x1c   :  { %v32_v20 = vrot.slane %v31_v19, 2 }
  0x1e   :  { %v33_v21 = vadd.f32 %v32_v20, %v31_v19 }
  0x20   :  { %v34_v22 = vrot.slane %v33_v21, 1 }
  0x22   :  { %v35_v23 = vadd.f32 %v34_v22, %v33_v21 }
  0x24   :  { %v36_v24 = vmul.f32 0.0625, %v35_v23 }
  0x26   :  { %v37_v25 = vadd.f32 1e-05, %v36_v24 }
  0x28   :  { %111 = vrsqrt.f32 %v37_v25 }
  0x35   :  { %v112_v26 = vpop.eup %111 }
  0x36   :  { %v39_v27 = vmul.f32 %v112_v26, %v25_v13  ;;  %v40_v28 = vmul.f32 %v112_v26, %v26_v14 }
  0x38   :  { %v42_v29 = vpack.c.bf16 %v40_v28, %v39_v27 }
  0x3a   :  { %102 = vmatpush3.bf16.msra.mxu0 %v42_v29 }
  0x3d   :  { %104 = vmatmul.mubr.msk.bf16.vlgmr.msra.gmra.mxu0 %vm49_vm1, %v41_v30 }
  0x7e   :  { %v47_v31 = vpop.permute.xlu0 %46 }
  0xfd   :  { %v87_v32 = vpop.f32.mrf.mxu0 }
  0xfe   :  { %v88_v33 = vadd.f32 %v87_v32, %v47_v31 }
  0xff   :  { %v105_v34 = vpop.f32.mrf.mxu0 }
 0x100   :  { %93 = vst [vmem:[%s154_s3] sm:$0xff] %v88_v33 }
 0x101   :  { %v90_v35 = vpop.f32.mrf.mxu0 }
 0x103   :  { %v106_v36 = vpop.f32.mrf.mxu0 }

</bundles_post_ra>
